<compile_context>
chip_gen: v5e
topology: v5e:2x2
jax: 0.10.0
libtpu: 0.0.40
codegen_flags: <defaults>
</compile_context>

<pallas_src>
import functools

import jax
import jax.numpy as jnp
from jax import lax
from jax.experimental import pallas as pl
from jax.experimental.pallas import tpu as pltpu


def _ce_label_smooth_kernel(logits_ref, targets_ref, loss_ref, *, epsilon, num_classes):
    """One batch tile: logits_ref (TB, C), targets_ref (TB, 1) int32, loss_ref (TB, 1) f32."""
    x = logits_ref[...].astype(jnp.float32)            # (TB, C) upcast in-kernel (bf16 OK)
    t = targets_ref[...]                                # (TB, 1) int32
    tb, c = x.shape

    # Row-wise statistics (all 2-D keepdims reductions over the lane axis).
    m = jnp.max(x, axis=1, keepdims=True)               # (TB, 1)
    e = jnp.exp(x - m)                                   # (TB, C) — EUP
    lse = jnp.log(jnp.sum(e, axis=1, keepdims=True))     # (TB, 1)
    sum_x = jnp.sum(x, axis=1, keepdims=True)             # (TB, 1)

    # x[row, target[row]] via iota-compare masked select (no (TB,C) one-hot temp).
    class_ids = lax.broadcasted_iota(jnp.int32, (tb, c), 1)
    x_t = jnp.sum(jnp.where(class_ids == t, x, 0.0), axis=1, keepdims=True)  # (TB, 1)

    # Folded label-smoothed cross entropy (per sample).
    loss_ref[...] = (
        (m + lse)
        - (1.0 - epsilon) * x_t
        - (epsilon / num_classes) * sum_x
    )


def _pick_block_rows(n, c, itemsize):
    # ~4 MiB of logits per tile -> double-buffered inputs + f32 working set stay
    # well inside the 32 MiB scoped-VMEM budget on every generation, while tiles
    # stay large enough to amortize per-grid-step overhead.
    budget_bytes = 4 * 1024 * 1024
    tb = budget_bytes // max(1, c * itemsize)
    if tb >= n:
        return n                       # single tile: block == full batch dim (always legal)
    return max(8, (tb // 8) * 8)       # sublane-aligned batch tile


def cross_entropy_label_smooth(logits, targets, *, num_classes, epsilon, block_rows=None):
    """logits: (N, C) float (f32 or bf16); targets: (N,) int labels. Returns scalar f32 loss."""
    n, c = logits.shape
    assert c == num_classes
    targets_2d = targets.astype(jnp.int32).reshape(n, 1)

    itemsize = jnp.dtype(logits.dtype).itemsize
    tb = block_rows if block_rows is not None else _pick_block_rows(n, c, itemsize)
    grid = (pl.cdiv(n, tb),)

    kernel = functools.partial(
        _ce_label_smooth_kernel, epsilon=float(epsilon), num_classes=int(num_classes)
    )

    per_sample = pl.pallas_call(
        kernel,
        out_shape=jax.ShapeDtypeStruct((n, 1), jnp.float32),
        grid_spec=pltpu.PrefetchScalarGridSpec(
            num_scalar_prefetch=0,
            grid=grid,
            in_specs=[
                pl.BlockSpec((tb, c), lambda i: (i, 0)),   # logits tile (class axis un-tiled)
                pl.BlockSpec((tb, 1), lambda i: (i, 0)),   # targets tile
            ],
            out_specs=pl.BlockSpec((tb, 1), lambda i: (i, 0)),  # per-sample losses
        ),
        compiler_params=pltpu.CompilerParams(
            dimension_semantics=("parallel",),            # independent tiles -> megacore on v7x
            vmem_limit_bytes=32 * 1024 * 1024,
        ),
        cost_estimate=pl.CostEstimate(
            flops=6 * n * c,
            transcendentals=n * c,
            bytes_accessed=n * c * itemsize + n * 4 + n * 4,
        ),
    )(logits, targets_2d)

    # Tiny epilogue in plain JAX: sum of exactly N values, divided by the true N
    # once (correct even when the last batch tile is a remainder tile).
    return jnp.sum(per_sample) / n


def _reference(logits, targets, num_classes, epsilon):
    # Pure-JAX reference mirroring the PyTorch module.
    log_probs = jax.nn.log_softmax(logits.astype(jnp.float32), axis=1)
    onehot = jax.nn.one_hot(targets, num_classes, dtype=jnp.float32)
    smoothed = (1.0 - epsilon) * onehot + epsilon / num_classes
    return jnp.mean(jnp.sum(-smoothed * log_probs, axis=1))


if __name__ == "__main__":
    epsilon = 0.1
    key = jax.random.PRNGKey(0)

    # Case 1: small shape matching the module spec (single tile).
    num_classes = 32
    batch = 8
    k1, k2, k3, k4 = jax.random.split(key, 4)
    logits = jax.random.normal(k1, (batch, num_classes), dtype=jnp.float32)
    targets = jax.random.randint(k2, (batch,), 0, num_classes, dtype=jnp.int32)

    loss = cross_entropy_label_smooth(
        logits, targets, num_classes=num_classes, epsilon=epsilon
    )
    loss = jax.block_until_ready(loss)
    ref = _reference(logits, targets, num_classes, epsilon)
    assert jnp.allclose(loss, ref, atol=1e-4, rtol=1e-5), (loss, ref)

    # Case 2: multi-tile grid with a remainder tile (exercises the pipelined,
    # "parallel" batch tiling and the true-N mean in the epilogue).
    num_classes2 = 128
    batch2 = 20
    logits2 = jax.random.normal(k3, (batch2, num_classes2), dtype=jnp.float32)
    targets2 = jax.random.randint(k4, (batch2,), 0, num_classes2, dtype=jnp.int32)

    loss2 = cross_entropy_label_smooth(
        logits2, targets2, num_classes=num_classes2, epsilon=epsilon, block_rows=8
    )
    loss2 = jax.block_until_ready(loss2)
    ref2 = _reference(logits2, targets2, num_classes2, epsilon)
    assert jnp.allclose(loss2, ref2, atol=1e-4, rtol=1e-5), (loss2, ref2)

    print("KERNEL_OK")
</pallas_src>

<mosaic_0001>
module attributes {stable_mosaic.version = 11 : i64} {
  func.func @_ce_label_smooth_kernel(%arg0: i32, %arg1: memref<8x32xf32, #tpu.memory_space<vmem>>, %arg2: memref<8x1xi32, #tpu.memory_space<vmem>>, %arg3: memref<8x1xf32, #tpu.memory_space<vmem>>) attributes {dimension_semantics = [#tpu.dimension_semantics<parallel>], iteration_bounds = array<i64: 1>, scalar_prefetch = 0 : i64, scratch_operands = 0 : i64, tpu.core_type = #tpu.core_type<tc>, window_params = [{transform_indices = @transform_0, window_bounds = array<i64: 8, 32>}, {transform_indices = @transform_1, window_bounds = array<i64: 8, 1>}, {transform_indices = @transform_2, window_bounds = array<i64: 8, 1>}]} {
    %c0 = arith.constant 0 : index
    %c0_0 = arith.constant 0 : index
    %0 = vector.load %arg1[%c0, %c0_0] : memref<8x32xf32, #tpu.memory_space<vmem>>, vector<8x32xf32>
    %c0_1 = arith.constant 0 : index
    %c0_2 = arith.constant 0 : index
    %1 = vector.load %arg2[%c0_1, %c0_2] : memref<8x1xi32, #tpu.memory_space<vmem>>, vector<8x1xi32>
    %cst = arith.constant dense<0xFF800000> : vector<8xf32>
    %2 = vector.multi_reduction <maximumf>, %0, %cst [1] : vector<8x32xf32> to vector<8xf32>
    %3 = vector.shape_cast %2 : vector<8xf32> to vector<8x1xf32>
    %4 = vector.broadcast %3 : vector<8x1xf32> to vector<8x32xf32>
    %5 = arith.subf %0, %4 : vector<8x32xf32>
    %6 = math.exp %5 : vector<8x32xf32>
    %cst_3 = arith.constant dense<0.000000e+00> : vector<8xf32>
    %7 = vector.multi_reduction <add>, %6, %cst_3 [1] : vector<8x32xf32> to vector<8xf32>
    %8 = vector.shape_cast %7 : vector<8xf32> to vector<8x1xf32>
    %9 = math.log %8 : vector<8x1xf32>
    %cst_4 = arith.constant dense<0.000000e+00> : vector<8xf32>
    %10 = vector.multi_reduction <add>, %0, %cst_4 [1] : vector<8x32xf32> to vector<8xf32>
    %11 = vector.shape_cast %10 : vector<8xf32> to vector<8x1xf32>
    %12 = tpu.iota {dimensions = array<i32: 1>} : vector<8x32xi32>
    %13 = vector.broadcast %1 : vector<8x1xi32> to vector<8x32xi32>
    %14 = arith.cmpi eq, %12, %13 : vector<8x32xi32>
    %cst_5 = arith.constant 0.000000e+00 : f32
    %15 = vector.broadcast %cst_5 : f32 to vector<8x32xf32>
    %16 = arith.select %14, %0, %15 : vector<8x32xi1>, vector<8x32xf32>
    %cst_6 = arith.constant dense<0.000000e+00> : vector<8xf32>
    %17 = vector.multi_reduction <add>, %16, %cst_6 [1] : vector<8x32xf32> to vector<8xf32>
    %18 = vector.shape_cast %17 : vector<8xf32> to vector<8x1xf32>
    %19 = arith.addf %3, %9 : vector<8x1xf32>
    %cst_7 = arith.constant 0.899999976 : f32
    %20 = vector.broadcast %cst_7 : f32 to vector<8x1xf32>
    %21 = arith.mulf %20, %18 : vector<8x1xf32>
    %22 = arith.subf %19, %21 : vector<8x1xf32>
    %cst_8 = arith.constant 3.125000e-03 : f32
    %23 = vector.broadcast %cst_8 : f32 to vector<8x1xf32>
    %24 = arith.mulf %23, %11 : vector<8x1xf32>
    %25 = arith.subf %22, %24 : vector<8x1xf32>
    %c0_9 = arith.constant 0 : index
    %c0_10 = arith.constant 0 : index
    %26 = vector.load %arg3[%c0_9, %c0_10] : memref<8x1xf32, #tpu.memory_space<vmem>>, vector<8x1xf32>
    tpu.vector_store %arg3[%c0_9, %c0_10], %25 {strides = array<i32>} : memref<8x1xf32, #tpu.memory_space<vmem>>, vector<8x1xf32>,
    return
  }
  func.func @transform_0(%arg0: i32) -> (i32, i32) {
    %c0_i32 = arith.constant 0 : i32
    %c0_i32_0 = arith.constant 0 : i32
    return %arg0, %c0_i32 : i32, i32
  }
  func.func @transform_1(%arg0: i32) -> (i32, i32) {
    %c0_i32 = arith.constant 0 : i32
    %c0_i32_0 = arith.constant 0 : i32
    return %arg0, %c0_i32 : i32, i32
  }
  func.func @transform_2(%arg0: i32) -> (i32, i32) {
    %c0_i32 = arith.constant 0 : i32
    %c0_i32_0 = arith.constant 0 : i32
    return %arg0, %c0_i32 : i32, i32
  }
}

</mosaic_0001>

<bundles_post_ra>
// kernel: tpu_custom_call.1
= control target key start
LH: loop header
LB: loop body
LE: loop exit
PB: predicated region body
PF: predicated region fallthrough
CT: control target
= control target key end

     0   :  { %vm13_vm0 = vcmask 261120   ;;  %v55_v1 = vmov 0   ;;  %v28_v10 = vlaneseq  ;;  %vm43_vm2 = vcmask 7168   ;;  %s84_s0 = inlined_call_operand.vmem [shape: f32[8,32], index: 0, kind: input, shape index: {}]   ;;  %s85_s1 = inlined_call_operand.vmem [shape: s32[8,1], index: 1, kind: input, shape index: {}]   ;;  %s86_s2 = inlined_call_operand.vmem [shape: f32[8,1], index: 2, kind: output, shape index: {}]  }
   0x1   :  { %v11_v0 = vld [vmem:[%s84_s0] sm:$0xff]  ;;  %50 = vset.pattern.permute.xlu0 %v55_v1 }
   0x2   :  { %v14_v2 = vsel %vm13_vm0, %v11_v0, -inf  ;;  %v12_v3 = vld [vmem:[%s85_s1] sm:$0xff]  ;;  %v25_v4 = vsel %vm13_vm0, %v11_v0, 0.0  ;;  %v29_v11 = vand.u32 127, %v28_v10 }
   0x3   :  { %15 = vmax.xlane.f32.xlu0 %v14_v2  ;;  %26 = vadd.xlane.f32.xlu2 %v25_v4 }
  0x17   :  { %31 = vperm.xlu0 %50, %v12_v3  }
  0x76   :  { %v16_v5 = vpop.xlane.xlu0 %15  ;;  %v27_v18 = vpop.xlane.xlu2 %26 }
  0x77   :  { %v17_v6 = vsub.f32 %v11_v0, %v16_v5  ;;  %v41_v22 = vmul.f32 0.003125, %v27_v18 }
  0x79   :  { %v18_v7 = vmul.f32 1.442695, %v17_v6 }
  0x7b   :  { %51 = vpow2.f32 %v18_v7 }
  0x81   :  { %v52_v8 = vpop.eup %51 }
  0x82   :  { %v20_v9 = vsel %vm13_vm0, %v52_v8, 0.0 }
  0x83   :  { %21 = vadd.xlane.f32.xlu1 %v20_v9 }
  0x89   :  { %v32_v12 = vpop.permute.xlu0 %31 }
  0x8a   :  { %vm33_vm1 = vcmp.eq.s32.totalorder %v29_v11, %v32_v12 }
  0x8b   :  { %v34_v13 = vsel %vm33_vm1, %v11_v0, 0.0 }
  0x8c   :  { %v35_v14 = vsel %vm13_vm0, %v34_v13, 0.0 }
  0x8d   :  { %36 = vadd.xlane.f32.xlu1 %v35_v14 }
  0xf6   :  { %v22_v15 = vpop.xlane.xlu1 %21 }
  0xf7   :  { %53 = vlog2.f32 %v22_v15 }
  0xfd   :  { %v54_v16 = vpop.eup %53 }
  0xfe   :  { %v24_v17 = vmul.f32 0.6931472, %v54_v16 }
 0x100   :  { %v38_v19 = vadd.f32 %v24_v17, %v16_v5  ;;  %v37_v20 = vpop.xlane.xlu1 %36 }
 0x101   :  { %v39_v21 = vmul.f32 0.9, %v37_v20 }
 0x103   :  { %v40_v23 = vsub.f32 %v38_v19, %v39_v21 }
 0x105   :  { %v42_v24 = vsub.f32 %v40_v23, %v41_v22 }
 0x107   :  { %44 = vst.msk [vmem:[%s86_s2] sm:$0xff] %vm43_vm2, %v42_v24 }

</bundles_post_ra>
